<compile_context>
chip_gen: v6e
topology: v6e:2x2x1
jax: 0.10.0
libtpu: 0.0.40
codegen_flags: <defaults>
</compile_context>

<pallas_src>
import functools

import jax
import jax.numpy as jnp
from jax.experimental import pallas as pl
from jax.experimental.pallas import tpu as pltpu


def _mla_kernel(x_ref, a_ref, o_ref, *scratch, acc_in_out, compute_dtype):
    s = pl.program_id(2)

    if acc_in_out:
        # Accumulate directly in the resident (1, TL, D) f32 output block.
        (denom_ref,) = scratch
        acc_shape, acc_dtype = o_ref.shape[1:], o_ref.dtype
        read_acc = lambda: o_ref[0]

        def write_acc(v):
            o_ref[0] = v
    else:
        acc_ref, denom_ref = scratch
        acc_shape, acc_dtype = acc_ref.shape, acc_ref.dtype
        read_acc = lambda: acc_ref[...]

        def write_acc(v):
            acc_ref[...] = v

    @pl.when(s == 0)
    def _init():
        write_acc(jnp.zeros(acc_shape, acc_dtype))
        denom_ref[...] = jnp.zeros(denom_ref.shape, denom_ref.dtype)

    x = x_ref[0]                              # (TS, D)
    a = a_ref[...]                            # (D, TL)
    if compute_dtype is not None:
        x = x.astype(compute_dtype)
        a = a.astype(compute_dtype)

    # scores = tanh(x @ A): MXU matmul + EUP tanh.  tanh bounds scores to
    # [-1, 1], so exp(scores) needs no max-subtraction pass.
    scores = jnp.tanh(jnp.dot(x, a, preferred_element_type=jnp.float32))  # (TS, TL) f32
    e = jnp.exp(scores)                                                   # (TS, TL) f32

    # Running softmax denominator over the sequence axis.
    denom_ref[...] += jnp.sum(e, axis=0, keepdims=True)                   # (1, TL)

    # acc += e^T @ x without materializing a transpose: contract the shared
    # leading S axis of both operands directly on the MXU.
    update = jax.lax.dot_general(
        e.astype(x.dtype), x,
        dimension_numbers=(((0,), (0,)), ((), ())),
        preferred_element_type=jnp.float32)                                # (TL, D)
    write_acc(read_acc() + update.astype(acc_dtype))

    @pl.when(s == pl.num_programs(2) - 1)
    def _finalize():
        # Normalize once, post-matmul: TL*D multiplies + one exact reciprocal
        # instead of S*L divides on the attention tile.  The (1,TL)->(TL,1)
        # relayout runs once per (l, b) block, which is negligible.
        inv = pl.reciprocal(denom_ref[...], approx=False)                  # (1, TL)
        o_ref[0] = (read_acc().astype(jnp.float32)
                    * jnp.transpose(inv)).astype(o_ref.dtype)


def _vmem_capacity_bytes():
    # Trace-time query of physical VMEM; fall back to the smallest current
    # per-TC VMEM (v7x: 64 MiB) if the query is unavailable.
    try:
        info = pltpu.get_tpu_info()
        cap = getattr(info, "vmem_capacity_bytes", None)
        if cap:
            return int(cap)
    except Exception:
        pass
    return 64 * 1024 * 1024


def _tile_candidates(n, align, cap):
    """Divisors of n that are multiples of `align`, capped at `cap`.
    The full dimension is always a legal block (full-extent rule)."""
    cands = {d for d in range(align, min(n, cap) + 1, align) if n % d == 0}
    cands.add(n)
    return sorted(cands)


def _select_tiles(S, D, L, s_align, x_bytes, a_bytes, o_bytes, acc_in_out,
                  budget, ts=None, tl=None):
    def working_set(ts_, tl_):
        w = 2 * ts_ * D * x_bytes          # x double buffer (streamed over S)
        w += 2 * D * tl_ * a_bytes         # A double buffer
        w += 2 * tl_ * D * o_bytes         # output double buffer
        if not acc_in_out:
            w += tl_ * D * 4               # f32 accumulator scratch
        w += 2 * ts_ * tl_ * 4             # (TS, TL) score / exp temporaries
        w += 8 * tl_ * 4                   # denominator scratch (padded)
        return w

    ts_cands = [ts] if ts is not None else _tile_candidates(S, s_align, min(S, 1024))
    tl_cands = [tl] if tl is not None else _tile_candidates(L, 128, min(L, 4096))

    # Prefer the largest label tile (raises arithmetic intensity / cuts x
    # re-streaming), then the largest sequence tile, within the VMEM budget.
    for tl_ in sorted(tl_cands, reverse=True):
        for ts_ in sorted(ts_cands, reverse=True):
            if working_set(ts_, tl_) <= budget:
                return ts_, tl_
    # Nothing fits the budget: take the smallest legal tiles and let the
    # raised vmem limit absorb it.
    return min(ts_cands), min(tl_cands)


def multi_label_attention(x, A, *, ts=None, tl=None, compute_dtype=None,
                          vmem_limit_bytes=None):
    """x: (B, S, D); A: (D, L) -> (B, L, D). Matches MultiLabelAttention.forward."""
    B, S, D = x.shape
    D2, L = A.shape
    assert D == D2, (D, D2)

    x_bytes = jnp.dtype(x.dtype).itemsize
    a_bytes = jnp.dtype(A.dtype).itemsize
    o_bytes = x_bytes
    # Sub-32-bit dtypes pack along sublanes: require 16 (bf16) / 32 (8-bit)
    # alignment on the streamed sequence tile, not just 8.
    s_align = {4: 8, 2: 16, 1: 32}.get(x_bytes, 8)

    # f32 outputs accumulate directly in the resident output block (no
    # duplicated (TL, D) residency); other dtypes get a f32 VMEM scratch.
    acc_in_out = jnp.dtype(x.dtype) == jnp.dtype(jnp.float32)

    # VMEM-aware limits: ~80% of physical (128 MiB v5e/v6e, 64 MiB v7x), with a
    # further-discounted budget for tile selection to leave headroom for
    # Mosaic-internal temporaries.
    vmem_cap = _vmem_capacity_bytes()
    if vmem_limit_bytes is None:
        vmem_limit_bytes = min(int(vmem_cap * 0.80), 112 * 1024 * 1024)
    budget = int(vmem_limit_bytes * 0.80)

    # Validate user tiles; invalid ones fall back to auto-selection.
    if ts is not None and not (S % ts == 0 and (ts % s_align == 0 or ts == S)):
        ts = None
    if tl is not None and not (L % tl == 0 and (tl % 128 == 0 or tl == L)):
        tl = None
    ts, tl = _select_tiles(S, D, L, s_align, x_bytes, a_bytes, o_bytes,
                           acc_in_out, budget, ts=ts, tl=tl)

    # Label axis outermost: A's block index is constant across b and s, so it
    # is fetched only L/tl times total.
    grid = (L // tl, B, S // ts)

    scratch_shapes = [pltpu.VMEM((1, tl), jnp.float32)]             # softmax denom
    if not acc_in_out:
        scratch_shapes.insert(0, pltpu.VMEM((tl, D), jnp.float32))  # accumulator

    kernel = functools.partial(_mla_kernel, acc_in_out=acc_in_out,
                               compute_dtype=compute_dtype)

    return pl.pallas_call(
        kernel,
        out_shape=jax.ShapeDtypeStruct((B, L, D), x.dtype),
        grid_spec=pltpu.PrefetchScalarGridSpec(
            num_scalar_prefetch=0,
            grid=grid,
            in_specs=[
                # x streamed over S (and b); re-fetched once per label tile.
                pl.BlockSpec((1, ts, D), lambda l, b, s: (b, s, 0)),
                # A tile: index independent of b and s -> no redundant DMA.
                pl.BlockSpec((D, tl), lambda l, b, s: (0, l)),
            ],
            out_specs=pl.BlockSpec((1, tl, D), lambda l, b, s: (b, l, 0)),
            scratch_shapes=scratch_shapes,
        ),
        compiler_params=pltpu.CompilerParams(
            dimension_semantics=("parallel", "parallel", "arbitrary"),
            vmem_limit_bytes=vmem_limit_bytes,
        ),
    )(x, A)


def _reference(x, A):
    xf = x.astype(jnp.float32)
    af = A.astype(jnp.float32)
    scores = jnp.tanh(jnp.einsum("bsd,dl->bsl", xf, af))
    attn = jax.nn.softmax(scores, axis=1)
    return jnp.einsum("bsl,bsd->bld", attn, xf)


def _check(key, B, S, D, L, dtype=jnp.float32, atol=1e-3, rtol=1e-3, **kw):
    kx, ka = jax.random.split(key)
    x = jax.random.normal(kx, (B, S, D), dtype=jnp.float32).astype(dtype)
    # torch.nn.init.uniform_(A, -0.1, 0.1) equivalent, deterministic.
    A = jax.random.uniform(ka, (D, L), dtype=jnp.float32,
                           minval=-0.1, maxval=0.1).astype(dtype)

    out = multi_label_attention(x, A, **kw)
    out = jax.block_until_ready(out)

    ref = _reference(x, A)
    assert out.shape == (B, L, D), out.shape
    err = float(jnp.max(jnp.abs(out.astype(jnp.float32) - ref)))
    assert jnp.allclose(out.astype(jnp.float32), ref, atol=atol, rtol=rtol), err


if __name__ == "__main__":
    key = jax.random.PRNGKey(0)
    k0, k1, k2, k3 = jax.random.split(key, 4)

    # Explicit tiles: multi-step S reduction, multiple L tiles per batch.
    _check(k0, B=2, S=256, D=128, L=256, ts=64, tl=128)
    # Auto (VMEM-aware) tile selection: whole-L label tile.
    _check(k1, B=2, S=256, D=128, L=256)
    # Small-shape path (whole-S / whole-L blocks), module-scale sizes.
    _check(k2, B=2, S=8, D=32, L=16)
    # bf16 input path: f32 scratch accumulator, bf16 MXU operands, looser tol.
    _check(k3, B=2, S=128, D=64, L=128, dtype=jnp.bfloat16, atol=5e-2, rtol=5e-2)

    print("KERNEL_OK")
</pallas_src>

<mosaic_0001>
module attributes {stable_mosaic.version = 11 : i64} {
  func.func @_mla_kernel(%arg0: i32, %arg1: i32, %arg2: i32, %arg3: memref<1x64x128xf32, #tpu.memory_space<vmem>>, %arg4: memref<128x128xf32, #tpu.memory_space<vmem>>, %arg5: memref<1x128x128xf32, #tpu.memory_space<vmem>>, %arg6: memref<1x128xf32, #tpu.memory_space<vmem>>) attributes {dimension_semantics = [#tpu.dimension_semantics<parallel>, #tpu.dimension_semantics<parallel>, #tpu.dimension_semantics<arbitrary>], iteration_bounds = array<i64: 2, 2, 4>, scalar_prefetch = 0 : i64, scratch_operands = 1 : i64, tpu.core_type = #tpu.core_type<tc>, window_params = [{transform_indices = @transform_0, window_bounds = array<i64: 1, 64, 128>}, {transform_indices = @transform_1, window_bounds = array<i64: 128, 128>}, {transform_indices = @transform_2, window_bounds = array<i64: 1, 128, 128>}]} {
    %c0_i32 = arith.constant 0 : i32
    %0 = arith.cmpi eq, %arg2, %c0_i32 : i32
    %1 = arith.extui %0 : i1 to i32
    %c0_i32_0 = arith.constant 0 : i32
    %2 = arith.cmpi ne, %1, %c0_i32_0 : i32
    scf.if %2 {
      %cst_18 = arith.constant 0.000000e+00 : f32
      %24 = vector.broadcast %cst_18 : f32 to vector<128x128xf32>
      %c0_19 = arith.constant 0 : index
      %c0_20 = arith.constant 0 : index
      %c0_21 = arith.constant 0 : index
      %25 = vector.load %arg5[%c0_19, %c0_20, %c0_21] : memref<1x128x128xf32, #tpu.memory_space<vmem>>, vector<1x128x128xf32>
      %26 = vector.shape_cast %25 : vector<1x128x128xf32> to vector<128x128xf32>
      %27 = vector.shape_cast %24 : vector<128x128xf32> to vector<1x128x128xf32>
      tpu.vector_store %arg5[%c0_19, %c0_20, %c0_21], %27 {strides = array<i32>} : memref<1x128x128xf32, #tpu.memory_space<vmem>>, vector<1x128x128xf32>,
      %cst_22 = arith.constant 0.000000e+00 : f32
      %28 = vector.broadcast %cst_22 : f32 to vector<1x128xf32>
      %c0_23 = arith.constant 0 : index
      %c0_24 = arith.constant 0 : index
      %29 = vector.load %arg6[%c0_23, %c0_24] : memref<1x128xf32, #tpu.memory_space<vmem>>, vector<1x128xf32>
      tpu.vector_store %arg6[%c0_23, %c0_24], %28 {strides = array<i32>} : memref<1x128xf32, #tpu.memory_space<vmem>>, vector<1x128xf32>,
    } else {
    }
    %c0 = arith.constant 0 : index
    %c0_1 = arith.constant 0 : index
    %c0_2 = arith.constant 0 : index
    %3 = vector.load %arg3[%c0, %c0_1, %c0_2] : memref<1x64x128xf32, #tpu.memory_space<vmem>>, vector<1x64x128xf32>
    %4 = vector.shape_cast %3 : vector<1x64x128xf32> to vector<64x128xf32>
    %c0_3 = arith.constant 0 : index
    %c0_4 = arith.constant 0 : index
    %5 = vector.load %arg4[%c0_3, %c0_4] : memref<128x128xf32, #tpu.memory_space<vmem>>, vector<128x128xf32>
    %cst = arith.constant dense<0.000000e+00> : vector<64x128xf32>
    %6 = tpu.matmul %4, %5, %cst {dimension_numbers = #tpu.dot_dimension_numbers<[1], [0], [0], [1], [0, 0, 1, 1], [], []>} : vector<64x128xf32>, vector<128x128xf32>, vector<64x128xf32> -> vector<64x128xf32>
    %7 = math.tanh %6 : vector<64x128xf32>
    %8 = math.exp %7 : vector<64x128xf32>
    %c0_5 = arith.constant 0 : index
    %c0_6 = arith.constant 0 : index
    %9 = vector.load %arg6[%c0_5, %c0_6] : memref<1x128xf32, #tpu.memory_space<vmem>>, vector<1x128xf32>
    %cst_7 = arith.constant dense<0.000000e+00> : vector<128xf32>
    %10 = vector.multi_reduction <add>, %8, %cst_7 [0] : vector<64x128xf32> to vector<128xf32>
    %11 = vector.shape_cast %10 : vector<128xf32> to vector<1x128xf32>
    %12 = arith.addf %9, %11 : vector<1x128xf32>
    %c0_8 = arith.constant 0 : index
    %c0_9 = arith.constant 0 : index
    %13 = vector.load %arg6[%c0_8, %c0_9] : memref<1x128xf32, #tpu.memory_space<vmem>>, vector<1x128xf32>
    tpu.vector_store %arg6[%c0_8, %c0_9], %12 {strides = array<i32>} : memref<1x128xf32, #tpu.memory_space<vmem>>, vector<1x128xf32>,
    %cst_10 = arith.constant dense<0.000000e+00> : vector<128x128xf32>
    %14 = tpu.matmul %8, %4, %cst_10 {dimension_numbers = #tpu.dot_dimension_numbers<[0], [0], [1], [1], [0, 1, 1, 1], [], []>} : vector<64x128xf32>, vector<64x128xf32>, vector<128x128xf32> -> vector<128x128xf32>
    %c0_11 = arith.constant 0 : index
    %c0_12 = arith.constant 0 : index
    %c0_13 = arith.constant 0 : index
    %15 = vector.load %arg5[%c0_11, %c0_12, %c0_13] : memref<1x128x128xf32, #tpu.memory_space<vmem>>, vector<1x128x128xf32>
    %16 = vector.shape_cast %15 : vector<1x128x128xf32> to vector<128x128xf32>
    %17 = arith.addf %16, %14 : vector<128x128xf32>
    %c0_14 = arith.constant 0 : index
    %c0_15 = arith.constant 0 : index
    %c0_16 = arith.constant 0 : index
    %18 = vector.load %arg5[%c0_14, %c0_15, %c0_16] : memref<1x128x128xf32, #tpu.memory_space<vmem>>, vector<1x128x128xf32>
    %19 = vector.shape_cast %18 : vector<1x128x128xf32> to vector<128x128xf32>
    %20 = vector.shape_cast %17 : vector<128x128xf32> to vector<1x128x128xf32>
    tpu.vector_store %arg5[%c0_14, %c0_15, %c0_16], %20 {strides = array<i32>} : memref<1x128x128xf32, #tpu.memory_space<vmem>>, vector<1x128x128xf32>,
    %c3_i32 = arith.constant 3 : i32
    %21 = arith.cmpi eq, %arg2, %c3_i32 : i32
    %22 = arith.extui %21 : i1 to i32
    %c0_i32_17 = arith.constant 0 : i32
    %23 = arith.cmpi ne, %22, %c0_i32_17 : i32
    scf.if %23 {
      %c0_18 = arith.constant 0 : index
      %c0_19 = arith.constant 0 : index
      %24 = vector.load %arg6[%c0_18, %c0_19] : memref<1x128xf32, #tpu.memory_space<vmem>>, vector<1x128xf32>
      %25 = tpu.reciprocal %24 : vector<1x128xf32> -> vector<1x128xf32>
      %c0_20 = arith.constant 0 : index
      %c0_21 = arith.constant 0 : index
      %c0_22 = arith.constant 0 : index
      %26 = vector.load %arg5[%c0_20, %c0_21, %c0_22] : memref<1x128x128xf32, #tpu.memory_space<vmem>>, vector<1x128x128xf32>
      %27 = vector.shape_cast %26 : vector<1x128x128xf32> to vector<128x128xf32>
      %28 = tpu.transpose %25, [1, 0] : vector<1x128xf32> -> vector<128x1xf32>
      %29 = vector.broadcast %28 : vector<128x1xf32> to vector<128x128xf32>
      %30 = arith.mulf %27, %29 : vector<128x128xf32>
      %c0_23 = arith.constant 0 : index
      %c0_24 = arith.constant 0 : index
      %c0_25 = arith.constant 0 : index
      %31 = vector.load %arg5[%c0_23, %c0_24, %c0_25] : memref<1x128x128xf32, #tpu.memory_space<vmem>>, vector<1x128x128xf32>
      %32 = vector.shape_cast %31 : vector<1x128x128xf32> to vector<128x128xf32>
      %33 = vector.shape_cast %30 : vector<128x128xf32> to vector<1x128x128xf32>
      tpu.vector_store %arg5[%c0_23, %c0_24, %c0_25], %33 {strides = array<i32>} : memref<1x128x128xf32, #tpu.memory_space<vmem>>, vector<1x128x128xf32>,
    } else {
    }
    return
  }
  func.func @transform_0(%arg0: i32, %arg1: i32, %arg2: i32) -> (i32, i32, i32) {
    %c0_i32 = arith.constant 0 : i32
    %c0_i32_0 = arith.constant 0 : i32
    return %arg1, %arg2, %c0_i32 : i32, i32, i32
  }
  func.func @transform_1(%arg0: i32, %arg1: i32, %arg2: i32) -> (i32, i32) {
    %c0_i32 = arith.constant 0 : i32
    %c0_i32_0 = arith.constant 0 : i32
    return %c0_i32, %arg0 : i32, i32
  }
  func.func @transform_2(%arg0: i32, %arg1: i32, %arg2: i32) -> (i32, i32, i32) {
    %c0_i32 = arith.constant 0 : i32
    %c0_i32_0 = arith.constant 0 : i32
    return %arg1, %arg0, %c0_i32 : i32, i32, i32
  }
}

</mosaic_0001>

<bundles_post_ra>
// kernel: tpu_custom_call.1
= control target key start
LH: loop header
LB: loop body
LE: loop exit
PB: predicated region body
PF: predicated region fallthrough
CT: control target
= control target key end

     0   :  { %s2059_s0 = inlined_call_operand.hbm [shape: f32[2,256,128], index: 0, kind: input, shape index: {}]   ;;  %s2060_s1 = inlined_call_operand.hbm [shape: f32[128,256], index: 1, kind: input, shape index: {}]   ;;  %s2061_s2 = inlined_call_operand.hbm [shape: f32[2,256,128], index: 2, kind: output, shape index: {}]  }
   0x1   :  { %2075 = sst [smem:[#allocation22_spill]] %s2059_s0 }
   0x2   :  { %2076 = sst [smem:[#allocation23_spill]] %s2061_s2 }
   0x3   :  { %7 = vsyncpa [#allocation4], 0 }
   0x4   :  { %9 = vsyncpa [#allocation4 + $0x1], 0 }
   0x5   :  { %10 = vsyncpa [#allocation7], 0 }
   0x6   :  { %12 = vsyncpa [#allocation7 + $0x1], 0 }
   0x7   :  { %13 = vsyncpa [#allocation5], 0 }
   0x8   :  { %15 = vsyncpa [#allocation5 + $0x1], 0  ;;  %s1602_s9 = smov 0   ;;  %s1604_s10 = smov 0  }
   0x9   :  { %s1606_s11 = smov 0   ;;  %s1608_s12 = smov 0  }
   0xa   :  { %s1610_s13 = smov 0   ;;  %s1612_s14 = smov 0  }
   0xb   :  { %s1614_s15 = smov 0   ;;  %s1616_s16 = smov 0  }
   0xc   :  { %s1618_s17 = smov 0   ;;  %s1620_s18 = smov 0  }
   0xd   :  { %s1622_s19 = smov 0   ;;  %s1624_s20 = smov 0  }
   0xe   :  { %s1626_s21 = smov 0   ;;  %s1628_s22 = smov 0  }
   0xf   :  { %s1630_s23 = smov 0   ;;  %s1632_s24 = smov 0  }
  0x10 LB: > { %2077 = sst [smem:[#allocation12_spill]] %s1515_s9  ;;  %s993_s25 = sadd.s32 4294967295, %s1575_s24   ;;  %s1575_s24 = sphi %s1632_s24, %s21_s24   ;;  %s1571_s23 = sphi %s1630_s23, %s2131_s23   ;;  %s1567_s22 = sphi %s1628_s22, %s2130_s22   ;;  %s1563_s21 = sphi %s1626_s21, %s2129_s21   ;;  %s1559_s20 = sphi %s1624_s20, %s2128_s20   ;;  %s1555_s19 = sphi %s1622_s19, %s2117_s19   ;;  %s1551_s18 = sphi %s1620_s18, %s2127_s18   ;;  %s1547_s17 = sphi %s1618_s17, %s2116_s17   ;;  %s1543_s16 = sphi %s1616_s16, %s2126_s16   ;;  %s1539_s15 = sphi %s1614_s15, %s2125_s15   ;;  %s1535_s14 = sphi %s1612_s14, %s2124_s14   ;;  %s1531_s13 = sphi %s1610_s13, %s2123_s13   ;;  %s1527_s12 = sphi %s1608_s12, %s2122_s12   ;;  %s1523_s11 = sphi %s1606_s11, %s2121_s11   ;;  %s1519_s10 = sphi %s1604_s10, %s2120_s10   ;;  %s1515_s9 = sphi %s1602_s9, %s2114_s9  }
  0x11   : > { %2078 = sst [smem:[#allocation13_spill]] %s1519_s10  ;;  %s994_s26 = sadd.s32 4294967294, %s1575_s24  }
  0x12   : > { %2079 = sst [smem:[#allocation14_spill]] %s1547_s17  ;;  %s33_s27 = sadd.s32 1, %s1563_s21 }
  0x13   : > { %2080 = sst [smem:[#allocation15_spill]] %s1551_s18  ;;  %s36_s28 = sadd.s32 1, %s1567_s22 }
  0x14   : > { %2081 = sst [smem:[#allocation16_spill]] %s1555_s19  ;;  %p34_p0 = scmp.ge.s32.totalorder %s33_s27, 4 }
  0x15   : > { %2082 = sst [smem:[#allocation17_spill]] %s1559_s20  ;;  %s49_s29 = sadd.s32 1, %s1547_s17 }
  0x16   : > { %2083 = sst [smem:[#allocation18_spill]] %s1567_s22  ;;  %p56_p1 = scmp.ne.s32.totalorder %s1547_s17, %s1543_s16 }
  0x17   : > { %p2071_p2 = scmp.eq.s32.totalorder %s1575_s24, 0  ;;  %s2133_s27 = smov (%p34_p0, %s33_s27), 0 }
  0x18   : > { %2084 = sst [smem:[#allocation19_spill]] %s2133_s27  ;;  %s2135_s28 = smov (!%p34_p0, %s36_s28), %s1567_s22 }
  0x19   : > { %s45_s30 = ssub.s32 %s1563_s21, %s2133_s27  ;;  %p1697_p3 = por %p2071_p2, %p56_p1 }
  0x1a   : > { %p38_p4 = scmp.ge.s32.totalorder %s2135_s28, 2  ;;  %p62_p5 = scmp.ne.s32.totalorder %s1543_s16, %s1539_s15 }
  0x1b   : > { %p1703_p6 = scmp.eq.s32.totalorder %s993_s25, 0  ;;  %p113_p7 = scmp.ne.s32.totalorder %s1523_s11, %s1519_s10 }
  0x1c   : > { %s1712_s5 = scalar_select %p38_p4, 0, %s2135_s28  }
  0x1d   : > { %p1716_p8 = por %p1703_p6, %p62_p5  ;;  %p114_p9 = scmp.eq.s32.totalorder %s993_s25, 15 }
  0x1e   : > { %2087 = sst [smem:[#allocation20_spill]] %s1712_s5  ;;  %s1722_s7 = ssub.s32 %s1567_s22, %s1712_s5 }
  0x1f   : > { %p119_p10 = scmp.ne.s32.totalorder %s1519_s10, %s1515_s9  ;;  %s46_s8 = sor.u32 %s45_s30, %s1722_s7 }
  0x20   : > { %p1727_p11 = por %p114_p9, %p113_p7  ;;  %p47_p12 = scmp.eq.s32.totalorder %s46_s8, 0 }
  0x21   : > { %p120_p13 = scmp.eq.s32.totalorder %s994_s26, 15  ;;  %p2070_p0 = scmp.lt.s32.totalorder %s1575_s24, 16 }
  0x22   : > { %s2089_s15 = scalar_select %p1727_p11, 1, 0 }
  0x23   : > { %s1733_s27 = scalar_select %p47_p12, %s1547_s17, %s49_s29  }
  0x24   : > { %p1735_p1 = por %p120_p13, %p119_p10  ;;  %s140_s25 = sand.u32 1, %s1547_s17  }
  0x25   : > { %2090 = sst [smem:[#allocation21_spill]] %s1733_s27  ;;  %s997_s5 = sshll.u32 %s140_s25, 6 }
  0x26   : > { %s2091_s2 = scalar_select %p1735_p1, 1, 0 }
  0x27   : > { %s998_s19 = sshll.u32 %s1563_s21, 3  ;;  %s999_s9 = sshll.u32 %s1567_s22, 5 }
  0x28   : > { %s144_s30 = scalar_lea.vmem [#allocation3], %s997_s5  ;;  %s150_s18 = sadd.s32 %s999_s9, %s998_s19 }
  0x29   : > { %s153_s20 = sshll.u32 %s144_s30, 4  ;;  %s1000_s10 = sshll.u32 %s150_s18, 7  ;;  %s154_s20 = int_to_ptr.vmem [resolvable:$true] %s153_s20 }
  0x2a   : > { %p1746_p5 = pnand %p2070_p0, %p1697_p3  ;;  %s2093_s0 = sld [smem:[#allocation22_spill]] }
  0x2b   : > { %s141_s17 = scalar_lea.sflag [#allocation4], %s140_s25  ;;  %s1368_s22 = scalar_lea.vmem %s154_s20, 1024 }
  0x2c   : > { %p1357_p7 = pneg %p1746_p5  ;;  %p1369_p9 = scmp.ne.s32.totalorder %s154_s20, %s1368_s22 }
  0x2d   : > { %s1577_s9 = smov [#allocation3]  }
  0x2e   : > { %p1371_p10 = pnand %p1369_p9, %p1357_p7  ;;  %s1373_s18 = sshll.u32 %s1577_s9, 4  ;;  %s1374_s18 = int_to_ptr.vmem [resolvable:$false] %s1373_s18 }
  0x2f   : > { %s1375_s19 = scalar_lea.vmem %s1374_s18, 2048  ;;  %p1376_p3 = scmp.lt.s32.totalorder %s154_s20, %s1374_s18 }
  0x30   : > { %s152_s27 = scalar_lea.hbm %s2093_s0, %s1000_s10  ;;  %p1372_p12 = pneg %p1371_p10 }
  0x31   : > { %p1377_p13 = scmp.lt.s32.totalorder %s1375_s19, %s1368_s22 }
  0x33   : > { %p1378_p0 = por %p1377_p13, %p1376_p3 }
  0x35   : > { %p1379_p2 = pnand %p1378_p0, %p1372_p12 }
  0x37   : > { %1382 = shalt.err (!%p1379_p2)
}
  0x38   : > { %s2072_s3 = smov 128   ;;  %s2073_s10 = smov 8  }
  0x39   : > { %1172 = dma.hbm_to_vmem [thread:$0]  (!%p1746_p5), %s152_s27, 1024, %s154_s20, %s141_s17, %s2072_s3, %s2072_s3, %s2073_s10  }
  0x3a   : > { %p1003_p2 = scmp.ge.s32.totalorder %s1575_s24, 1  ;;  %p181_p0 = scmp.lt.s32.totalorder %s1575_s24, 17 }
  0x3b   : > { %s40_s5 = sadd.s32 1, %s1571_s23  ;;  %s75_s25 = sadd.s32 1, %s1535_s14 }
  0x3c   : > { %p1762_p7 = pnand %p1003_p2, %p181_p0  ;;  %s2137_s5 = smov (!%p38_p4, %s40_s5), %s1571_s23 }
  0x3d   : > { %p82_p9 = scmp.ne.s32.totalorder %s1535_s14, %s1531_s13  ;;  %p42_p10 = scmp.ge.s32.totalorder %s2137_s5, 2 }
  0x3e   : > { %p88_p12 = scmp.ne.s32.totalorder %s1531_s13, %s1527_s12  ;;  %p2095_p3 = scmp.eq.s32.totalorder %s1575_s24, 0 }
  0x3f   : > { %s103_s20 = sadd.s32 1, %s1523_s11  ;;  %s2139_s5 = smov (%p42_p10, %s2137_s5), 0 }
  0x40   : > { %p1777_p13 = por %p82_p9, %p2095_p3  ;;  %p1786_p5 = por %p88_p12, %p1703_p6 }
  0x41   : > { %s163_s28 = sand.u32 1, %s1535_s14   ;;  %s72_s30 = ssub.s32 %s1571_s23, %s2139_s5 }
  0x42   : > { %p73_p4 = scmp.eq.s32.totalorder %s72_s30, 0  ;;  %s100_s12 = sor.u32 %s72_s30, %s1722_s7 }
  0x43   : > { %p101_p2 = scmp.eq.s32.totalorder %s100_s12, 0  ;;  %s1001_s26 = sshll.u32 %s163_s28, 7 }
  0x44   : > { %s1795_s29 = scalar_select %p73_p4, %s1535_s14, %s75_s25  }
  0x45   : > { %s1798_s8 = scalar_select %p101_p2, %s1523_s11, %s103_s20  }
  0x46   : > { %s1002_s9 = sshll.u32 %s1571_s23, 7  ;;  %s167_s3 = scalar_lea.vmem [#allocation6], %s1001_s26 }
  0x47   : > { %s172_s4 = scalar_lea.hbm %s2060_s1, %s1002_s9  ;;  %s173_s10 = sshll.u32 %s167_s3, 4  ;;  %s174_s10 = int_to_ptr.vmem [resolvable:$true] %s173_s10 }
  0x48   : > { %p2098_p6 = scmp.lt.s32.totalorder %s1575_s24, 16  ;;  %s164_s7 = scalar_lea.sflag [#allocation7], %s163_s28 }
  0x49   : > { %s1396_s25 = scalar_lea.vmem %s174_s10, 2048  ;;  %s1580_s20 = smov [#allocation6]  }
  0x4a   : > { %p1808_p0 = pnand %p2098_p6, %p1777_p13  ;;  %p1397_p10 = scmp.ne.s32.totalorder %s174_s10, %s1396_s25 }
  0x4b   : > { %s1401_s30 = sshll.u32 %s1580_s20, 4  ;;  %s1402_s30 = int_to_ptr.vmem [resolvable:$false] %s1401_s30 }
  0x4c   : > { %p1385_p9 = pneg %p1808_p0  ;;  %s1403_s12 = scalar_lea.vmem %s1402_s30, 4096 }
  0x4d   : > { %p1404_p4 = scmp.lt.s32.totalorder %s174_s10, %s1402_s30  ;;  %p1405_p2 = scmp.lt.s32.totalorder %s1403_s12, %s1396_s25 }
  0x4e   : > { %p1399_p12 = pnand %p1397_p10, %p1385_p9 }
  0x4f   : > { %p1406_p1 = por %p1405_p2, %p1404_p4 }
  0x50   : > { %p1400_p3 = pneg %p1399_p12 }
  0x52   : > { %p1407_p11 = pnand %p1406_p1, %p1400_p3 }
  0x54   : > { %1410 = shalt.err (!%p1407_p11)
}
  0x55   : > { %s1581_s3 = smov 256   ;;  %s2100_s17 = smov 8  }
  0x56   : > { %s2101_s28 = smov 128   ;;  %185 = sbr.rel (%p1762_p7) target bundleno = 1117 (0x45d), region = 28 }
  0x57   : > { %1175 = dma.hbm_to_vmem [thread:$0]  (!%p1808_p0), %s172_s4, 2048, %s174_s10, %s164_s7, %s1581_s3, %s2101_s28, %s2100_s17  }
  0x58   : > { %s187_s26 = sand.u32 (!%p1762_p7), 1, %s1543_s16  }
  0x59   : > { %s1004_s9 = sshll.u32 (!%p1762_p7), %s187_s26, 6  ;;  %s188_s18 = scalar_lea.sflag (!%p1762_p7), [#allocation4], %s187_s26 }
  0x5a   : > { %s1821_s19 = scalar_lea.vmem (!%p1762_p7), [#allocation3], %s1004_s9 }
  0x5b   : > { %1502 = dma.done.wait (%p1716_p8), %s188_s18, 1024  }
  0x5c   : > { %1504 = vsyncadd (%p1716_p8), %s188_s18, 4294966272  ;;  %s196_s0 = sand.u32 1, %s1531_s13  }
  0x5d   : > { %s1005_s25 = sshll.u32 %s196_s0, 7  ;;  %s197_s10 = scalar_lea.sflag [#allocation7], %s196_s0 }
  0x5e   : > { %s1828_s4 = scalar_lea.vmem [#allocation6], %s1005_s25 }
  0x5f   : > { %1506 = dma.done.wait (%p1786_p5), %s197_s10, 2048  }
  0x60   : > { %1508 = vsyncadd (%p1786_p5), %s197_s10, 4294965248  ;;  %s2102_s22 = sld [smem:[#allocation13_spill]] }
  0x61   : > { %s2103_s6 = sld [smem:[#allocation15_spill]] }
  0x66   : > { %s223_s7 = sand.u32 1, %s2102_s22  }
  0x67   : > { %s1006_s20 = sshll.u32 %s223_s7, 7  ;;  %p1007_p8 = scmp.ne.s32.totalorder %s2103_s6, 0 }
  0x68   : > { %s1837_s30 = scalar_lea.vmem [#allocation8], %s1006_s20 }
  0x69   : > { %231 = sbr.rel (%p1007_p8) target bundleno = 120 (0x78), region = 40 }
  0x6e   : > { %v1582_v0 = vmov 0.0  }
  0x6f   : > { %232 = vst [vmem:[%s1837_s30] sm:$0xff] %v1582_v0  ;;  %233 = vst [vmem:[%s1837_s30 + $0x8] sm:$0xff] %v1582_v0 }
  0x70   : > { %234 = vst [vmem:[%s1837_s30 + $0x10] sm:$0xff] %v1582_v0  ;;  %235 = vst [vmem:[%s1837_s30 + $0x18] sm:$0xff] %v1582_v0 }
  0x71   : > { %236 = vst [vmem:[%s1837_s30 + $0x20] sm:$0xff] %v1582_v0  ;;  %237 = vst [vmem:[%s1837_s30 + $0x28] sm:$0xff] %v1582_v0 }
  0x72   : > { %238 = vst [vmem:[%s1837_s30 + $0x30] sm:$0xff] %v1582_v0  ;;  %239 = vst [vmem:[%s1837_s30 + $0x38] sm:$0xff] %v1582_v0 }
  0x73   : > { %240 = vst [vmem:[%s1837_s30 + $0x40] sm:$0xff] %v1582_v0  ;;  %241 = vst [vmem:[%s1837_s30 + $0x48] sm:$0xff] %v1582_v0 }
  0x74   : > { %242 = vst [vmem:[%s1837_s30 + $0x50] sm:$0xff] %v1582_v0  ;;  %243 = vst [vmem:[%s1837_s30 + $0x58] sm:$0xff] %v1582_v0 }
  0x75   : > { %244 = vst [vmem:[%s1837_s30 + $0x60] sm:$0xff] %v1582_v0  ;;  %245 = vst [vmem:[%s1837_s30 + $0x68] sm:$0xff] %v1582_v0 }
  0x76   : > { %246 = vst [vmem:[%s1837_s30 + $0x70] sm:$0xff] %v1582_v0  ;;  %247 = vst [vmem:[%s1837_s30 + $0x78] sm:$0xff] %v1582_v0 }
  0x77   : > { %248 = vst [vmem:[#allocation2] sm:$0x1] %v1582_v0 }
  0x78 PF: > { %v272_v1 = vld [vmem:[%s1828_s4 + $0x78] sm:$0xff]  ;;  %v271_v2 = vld [vmem:[%s1828_s4 + $0x70] sm:$0xff]  ;;  %v270_v3 = vld [vmem:[%s1828_s4 + $0x68] sm:$0xff]  ;;  %vm450_vm0 = vcmask 523264   ;;  %s2104_s27 = sld [smem:[#allocation15_spill]] }
  0x79   : > { %1079 = vmatprep.subr.mxu0 %v272_v1  ;;  %v269_v4 = vld [vmem:[%s1828_s4 + $0x60] sm:$0xff]  ;;  %v268_v6 = vld [vmem:[%s1828_s4 + $0x58] sm:$0xff]  ;;  %v267_v8 = vld [vmem:[%s1828_s4 + $0x50] sm:$0xff] }
  0x7a   : > { %1080 = vmatpush3.msra.mxu0 %v272_v1  ;;  %v249_v5 = vld [vmem:[%s1821_s19] sm:$0xff]  ;;  %v1863_v7 = vld [vmem:[%s1821_s19 + $0x38] sm:$0xff]  ;;  %v255_v9 = vld [vmem:[%s1821_s19 + $0x30] sm:$0xff] }
  0x7b   : > { %1081 = vmatprep.subr.mxu0 %v271_v2  ;;  %1111 = vmatprep.mubr.f32.mxu0 %v249_v5  ;;  %v266_v10 = vld [vmem:[%s1828_s4 + $0x48] sm:$0xff]  ;;  %v265_v12 = vld [vmem:[%s1828_s4 + $0x40] sm:$0xff]  ;;  %v264_v14 = vld [vmem:[%s1828_s4 + $0x38] sm:$0xff] }
  0x7c   : > { %1082 = vmatpush3.msra.mxu0 %v271_v2  ;;  %1123 = vmatprep.subr.mxu1 %v1863_v7  ;;  %v254_v11 = vld [vmem:[%s1821_s19 + $0x28] sm:$0xff]  ;;  %v253_v13 = vld [vmem:[%s1821_s19 + $0x20] sm:$0xff]  ;;  %v252_v15 = vld [vmem:[%s1821_s19 + $0x18] sm:$0xff] }
  0x7d   : > { %1083 = vmatprep.subr.mxu0 %v270_v3  ;;  %1124 = vmatpush3.msra.mxu1 %v1863_v7  ;;  %v263_v16 = vld [vmem:[%s1828_s4 + $0x30] sm:$0xff]  ;;  %v262_v18 = vld [vmem:[%s1828_s4 + $0x28] sm:$0xff]  ;;  %v261_v20 = vld [vmem:[%s1828_s4 + $0x20] sm:$0xff] }
  0x7e   : > { %1084 = vmatpush3.msra.mxu0 %v270_v3  ;;  %1125 = vmatprep.subr.mxu1 %v255_v9  ;;  %v251_v17 = vld [vmem:[%s1821_s19 + $0x10] sm:$0xff]  ;;  %v250_v19 = vld [vmem:[%s1821_s19 + $0x8] sm:$0xff]  ;;  %v260_v21 = vld [vmem:[%s1828_s4 + $0x18] sm:$0xff]  ;;  %p1024_p11 = scmp.ne.s32.totalorder %s2104_s27, 3 }
  0x7f   : > { %1085 = vmatprep.subr.mxu0 %v269_v4  ;;  %1126 = vmatpush3.msra.mxu1 %v255_v9  ;;  %v259_v22 = vld [vmem:[%s1828_s4 + $0x10] sm:$0xff]  ;;  %v258_v23 = vld [vmem:[%s1828_s4 + $0x8] sm:$0xff]  ;;  %v257_v24 = vld [vmem:[%s1828_s4] sm:$0xff] }
  0x80   : > { %1086 = vmatpush3.msra.mxu0 %v269_v4  ;;  %1127 = vmatprep.subr.mxu1 %v254_v11 }
  0x81   : > { %1087 = vmatprep.subr.mxu0 %v268_v6  ;;  %1128 = vmatpush3.msra.mxu1 %v254_v11 }
  0x82   : > { %1088 = vmatpush3.msra.mxu0 %v268_v6  ;;  %1129 = vmatprep.subr.mxu1 %v253_v13 }
  0x83   : > { %1089 = vmatprep.subr.mxu0 %v267_v8  ;;  %1130 = vmatpush3.msra.mxu1 %v253_v13 }
  0x84   : > { %1090 = vmatpush3.msra.mxu0 %v267_v8  ;;  %1131 = vmatprep.subr.mxu1 %v252_v15 }
  0x85   : > { %1091 = vmatprep.subr.mxu0 %v266_v10  ;;  %1132 = vmatpush3.msra.mxu1 %v252_v15 }
  0x86   : > { %1092 = vmatpush3.msra.mxu0 %v266_v10  ;;  %1133 = vmatprep.subr.mxu1 %v251_v17 }
  0x87   : > { %1093 = vmatprep.subr.mxu0 %v265_v12  ;;  %1134 = vmatpush3.msra.mxu1 %v251_v17 }
  0x88   : > { %1094 = vmatpush3.msra.mxu0 %v265_v12  ;;  %1135 = vmatprep.subr.mxu1 %v250_v19 }
  0x89   : > { %1095 = vmatprep.subr.mxu0 %v264_v14  ;;  %1136 = vmatpush3.msra.mxu1 %v250_v19 }
  0x8a   : > { %1096 = vmatpush3.msra.mxu0 %v264_v14  ;;  %1137 = vmatprep.subr.mxu1 %v249_v5 }
  0x8b   : > { %1097 = vmatprep.subr.mxu0 %v263_v16  ;;  %1138 = vmatpush3.msra.mxu1 %v249_v5  ;;  %v402_v5 = vld [vmem:[#allocation2] sm:$0x1] }
  0x8c   : > { %1098 = vmatpush3.msra.mxu0 %v263_v16 }
  0x8d   : > { %1099 = vmatprep.subr.mxu0 %v262_v18 }
  0x8e   : > { %1100 = vmatpush3.msra.mxu0 %v262_v18 }
  0x8f   : > { %1101 = vmatprep.subr.mxu0 %v261_v20 }
  0x90   : > { %1102 = vmatpush3.msra.mxu0 %v261_v20 }
  0x91   : > { %1103 = vmatprep.subr.mxu0 %v260_v21 }
  0x92   : > { %1104 = vmatpush3.msra.mxu0 %v260_v21 }
  0x93   : > { %1105 = vmatprep.subr.mxu0 %v259_v22 }
  0x94   : > { %1106 = vmatpush3.msra.mxu0 %v259_v22 }
  0x95   : > { %1107 = vmatprep.subr.mxu0 %v258_v23 }
  0x96   : > { %1108 = vmatpush3.msra.mxu0 %v258_v23 }
  0x97   : > { %1109 = vmatprep.subr.mxu0 %v257_v24 }
  0x98   : > { %1110 = vmatpush3.msra.mxu0 %v257_v24  ;;  %v645_v24 = vld [vmem:[%s1837_s30 + $0x8] sm:$0xff] }
  0x99   : > { %1112 = vmatmul.mubr.f32.vlgmr.msra.gmra.mxu0 %v250_v19 }
  0x9a   : > { %1114 = vmatprep.mubr.f32.mxu0 %v251_v17 }
  0x9d   : > { %1115 = vmatmul.mubr.f32.gmra.mxu0 %v252_v15 }
  0x9e   : > { %1117 = vmatprep.mubr.f32.mxu0 %v253_v13 }
  0xa1   : > { %1118 = vmatmul.mubr.f32.gmra.mxu0 %v254_v11 }
  0xa2   : > { %1120 = vmatprep.mubr.f32.mxu0 %v255_v9 }
  0xa5   : > { %1121 = vmatmul.mubr.f32.gmra.mxu0 %v1863_v7 }
 0x159   : > { %v1113_v25 = vpop.f32.mrf.mxu0 }
 0x15a   : > { %1319 = vtanh.f32 %v1113_v25 }
 0x15b   : > { %v339_v26 = vpop.f32.mrf.mxu0 }
 0x15c   : > { %1321 = vtanh.f32 %v339_v26  ;;  %v644_v26 = vld [vmem:[%s1837_s30] sm:$0xff] }
 0x15d   : > { %v1116_v27 = vpop.f32.mrf.mxu0 }
 0x15e   : > { %1323 = vtanh.f32 %v1116_v27 }
 0x15f   : > { %v349_v28 = vpop.f32.mrf.mxu0 }
 0x160   : > { %1325 = vtanh.f32 %v349_v28 }
 0x161   : > { %v1119_v29 = vpop.f32.mrf.mxu0 }
 0x162   : > { %1327 = vtanh.f32 %v1119_v29 }
 0x163   : > { %v359_v30 = vpop.f32.mrf.mxu0 }
 0x164   : > { %1329 = vtanh.f32 %v359_v30  ;;  %v647_v30 = vld [vmem:[%s1837_s30 + $0x18] sm:$0xff] }
 0x165   : > { %v1122_v31 = vpop.f32.mrf.mxu0 }
 0x166   : > { %1331 = vtanh.f32 %v1122_v31 }
 0x167   : > { %v1320_v32 = vpop.eup %1319  ;;  %v369_v33 = vpop.f32.mrf.mxu0 }
 0x168   : > { %1333 = vtanh.f32 %v369_v33  ;;  %v388_v35 = vmul.f32 1.442695, %v1320_v32  ;;  %v646_v32 = vld [vmem:[%s1837_s30 + $0x10] sm:$0xff] }
 0x169   : > { %v1322_v34 = vpop.eup %1321 }
 0x16a   : > { %v386_v36 = vmul.f32 1.442695, %v1322_v34 }
 0x16b   : > { %v1324_v37 = vpop.eup %1323 }
 0x16c   : > { %1335 = vpow2.f32 %v386_v36  ;;  %v392_v38 = vmul.f32 1.442695, %v1324_v37  ;;  %v649_v36 = vld [vmem:[%s1837_s30 + $0x28] sm:$0xff] }
 0x16d   : > { %v1326_v39 = vpop.eup %1325  ;;  %1337 = vpow2.f32 %v388_v35 }
 0x16e   : > { %v390_v40 = vmul.f32 1.442695, %v1326_v39  ;;  %1339 = vpow2.f32 %v392_v38  ;;  %v648_v38 = vld [vmem:[%s1837_s30 + $0x20] sm:$0xff] }
 0x16f   : > { %v1328_v41 = vpop.eup %1327 }
 0x170   : > { %1341 = vpow2.f32 %v390_v40  ;;  %v396_v42 = vmul.f32 1.442695, %v1328_v41 }
 0x171   : > { %v1330_v43 = vpop.eup %1329 }
 0x172   : > { %v394_v44 = vmul.f32 1.442695, %v1330_v43  ;;  %1343 = vpow2.f32 %v396_v42  ;;  %v651_v42 = vld [vmem:[%s1837_s30 + $0x38] sm:$0xff] }
 0x173   : > { %v1332_v45 = vpop.eup %1331 }
 0x174   : > { %1345 = vpow2.f32 %v394_v44  ;;  %v400_v46 = vmul.f32 1.442695, %v1332_v45  ;;  %v650_v44 = vld [vmem:[%s1837_s30 + $0x30] sm:$0xff] }
 0x175   : > { %v1334_v47 = vpop.eup %1333 }
 0x176   : > { %v398_v48 = vmul.f32 1.442695, %v1334_v47  ;;  %1347 = vpow2.f32 %v400_v46 }
 0x178   : > { %1349 = vpow2.f32 %v398_v48  ;;  %v653_v48 = vld [vmem:[%s1837_s30 + $0x48] sm:$0xff] }
 0x179   : > { %v1336_v49 = vpop.eup %1335 }
 0x17a   : > { %418 = vxpose.xlu0.b32.start [1/8] (short) %v1336_v49, 128  ;;  %v1338_v50 = vpop.eup %1337 }
 0x17b   : > { %v1340_v51 = vpop.eup %1339  ;;  %v403_v52 = vadd.f32 %v1338_v50, %v1336_v49 }
 0x17d   : > { %v1342_v53 = vpop.eup %1341 }
 0x17e   : > { %v404_v54 = vadd.f32 %v1342_v53, %v403_v52  ;;  %419 = vxpose.xlu0.b32.cont [2/8] (short) %v1338_v50, 128  ;;  %v652_v50 = vld [vmem:[%s1837_s30 + $0x40] sm:$0xff] }
 0x17f   : > { %v1344_v55 = vpop.eup %1343 }
 0x180   : > { %v405_v56 = vadd.f32 %v1340_v51, %v404_v54  ;;  %v655_v54 = vld [vmem:[%s1837_s30 + $0x58] sm:$0xff] }
 0x181   : > { %v1346_v57 = vpop.eup %1345 }
 0x182   : > { %v406_v58 = vadd.f32 %v1346_v57, %v405_v56  ;;  %420 = vxpose.xlu0.b32.cont [3/8] (short) %v1342_v53, 128  ;;  %v654_v56 = vld [vmem:[%s1837_s30 + $0x50] sm:$0xff] }
 0x183   : > { %v1348_v59 = vpop.eup %1347 }
 0x184   : > { %v407_v60 = vadd.f32 %v1344_v55, %v406_v58 }
 0x185   : > { %v1350_v61 = vpop.eup %1349 }
 0x186   : > { %v408_v62 = vadd.f32 %v1350_v61, %v407_v60  ;;  %421 = vxpose.xlu0.b32.cont [4/8] (short) %v1340_v51, 128  ;;  %v657_v60 = vld [vmem:[%s1837_s30 + $0x68] sm:$0xff] }
 0x188   : > { %v409_v63 = vadd.f32 %v1348_v59, %v408_v62  ;;  %v656_v62 = vld [vmem:[%s1837_s30 + $0x60] sm:$0xff] }
 0x18a   : > { %v410_v0 = vrot.slane %v409_v63, 4  ;;  %422 = vxpose.xlu0.b32.cont [5/8] (short) %v1346_v57, 128 }
 0x18c   : > { %v411_v1 = vadd.f32 %v410_v0, %v409_v63 }
 0x18e   : > { %v412_v2 = vrot.slane %v411_v1, 2  ;;  %423 = vxpose.xlu0.b32.cont [6/8] (short) %v1344_v55, 128 }
 0x190   : > { %v413_v3 = vadd.f32 %v412_v2, %v411_v1  ;;  %v659_v2 = vld [vmem:[%s1837_s30 + $0x78] sm:$0xff] }
 0x192   : > { %v414_v4 = vrot.slane %v413_v3, 1  ;;  %424 = vxpose.xlu0.b32.cont [7/8] (short) %v1350_v61, 128 }
 0x194   : > { %v415_v6 = vadd.f32 %v414_v4, %v413_v3  ;;  %v658_v4 = vld [vmem:[%s1837_s30 + $0x70] sm:$0xff] }
 0x196   : > { %v416_v7 = vadd.f32 %v415_v6, %v402_v5  ;;  %425 = vxpose.xlu0.b32.end [8/8] (short) %v1348_v59, 128 }
 0x198   : > { %417 = vst [vmem:[#allocation2] sm:$0x1] %v416_v7 }
 0x1f6   : > { %v434_v8 = vpop.trf.xlu0 }
 0x1f7   : > { %1139 = vmatprep.mubr.msk.f32.mxu1 %vm450_vm0, %v434_v8 }
 0x1fa   : > { %v435_v9 = vpop.trf.xlu0 }
 0x1fb   : > { %1140 = vmatmul.mubr.msk.f32.vlgmr.msra.gmra.mxu1 %vm450_vm0, %v435_v9 }
 0x1fe   : > { %v436_v10 = vpop.trf.xlu0 }
 0x1ff   : > { %1142 = vmatprep.mubr.msk.f32.mxu1 %vm450_vm0, %v436_v10 }
 0x202   : > { %v437_v11 = vpop.trf.xlu0 }
 0x203   : > { %1143 = vmatmul.mubr.msk.f32.gmra.mxu1 %vm450_vm0, %v437_v11 }
 0x206   : > { %v438_v12 = vpop.trf.xlu0 }
 0x207   : > { %1145 = vmatprep.mubr.msk.f32.mxu1 %vm450_vm0, %v438_v12 }
 0x20a   : > { %v439_v13 = vpop.trf.xlu0 }
 0x20b   : > { %1146 = vmatmul.mubr.msk.f32.gmra.mxu1 %vm450_vm0, %v439_v13 }
 0x20e   : > { %v440_v14 = vpop.trf.xlu0 }
 0x20f   : > { %1148 = vmatprep.mubr.msk.f32.mxu1 %vm450_vm0, %v440_v14 }
 0x212   : > { %v441_v15 = vpop.trf.xlu0 }
 0x213   : > { %1149 = vmatmul.mubr.msk.f32.gmra.mxu1 %vm450_vm0, %v441_v15 }
 0x216   : > { %v442_v16 = vpop.trf.xlu0 }
 0x217   : > { %1151 = vmatprep.mubr.msk.f32.mxu1 %vm450_vm0, %v442_v16 }
 0x21a   : > { %v443_v17 = vpop.trf.xlu0 }
 0x21b   : > { %1152 = vmatmul.mubr.msk.f32.gmra.mxu1 %vm450_vm0, %v443_v17 }
 0x21e   : > { %v444_v18 = vpop.trf.xlu0 }
 0x21f   : > { %1154 = vmatprep.mubr.msk.f32.mxu1 %vm450_vm0, %v444_v18 }
 0x222   : > { %v445_v19 = vpop.trf.xlu0 }
 0x223   : > { %1155 = vmatmul.mubr.msk.f32.gmra.mxu1 %vm450_vm0, %v445_v19 }
 0x226   : > { %v446_v20 = vpop.trf.xlu0 }
 0x227   : > { %1157 = vmatprep.mubr.msk.f32.mxu1 %vm450_vm0, %v446_v20 }
 0x22a   : > { %v447_v21 = vpop.trf.xlu0 }
 0x22b   : > { %1158 = vmatmul.mubr.msk.f32.gmra.mxu1 %vm450_vm0, %v447_v21 }
 0x22e   : > { %v448_v22 = vpop.trf.xlu0 }
 0x22f   : > { %1160 = vmatprep.mubr.msk.f32.mxu1 %vm450_vm0, %v448_v22 }
 0x232   : > { %v449_v23 = vpop.trf.xlu0 }
 0x233   : > { %1161 = vmatmul.mubr.msk.f32.gmra.mxu1 %vm450_vm0, %v449_v23 }
 0x2bb   : > { %v1141_v25 = vpop.f32.mrf.mxu1 }
 0x2bc   : > { %v661_v27 = vadd.f32 %v1141_v25, %v645_v24 }
 0x2bd   : > { %v565_v28 = vpop.f32.mrf.mxu1 }
 0x2be   : > { %677 = vst [vmem:[%s1837_s30 + $0x8] sm:$0xff] %v661_v27  ;;  %v660_v29 = vadd.f32 %v644_v26, %v565_v28 }
 0x2c0   : > { %676 = vst [vmem:[%s1837_s30] sm:$0xff] %v660_v29 }
 0x2c3   : > { %v1144_v31 = vpop.f32.mrf.mxu1 }
 0x2c4   : > { %v663_v33 = vadd.f32 %v1144_v31, %v647_v30 }
 0x2c5   : > { %v575_v34 = vpop.f32.mrf.mxu1 }
 0x2c6   : > { %679 = vst [vmem:[%s1837_s30 + $0x18] sm:$0xff] %v663_v33  ;;  %v662_v35 = vadd.f32 %v646_v32, %v575_v34 }
 0x2c8   : > { %678 = vst [vmem:[%s1837_s30 + $0x10] sm:$0xff] %v662_v35 }
 0x2cb   : > { %v1147_v37 = vpop.f32.mrf.mxu1 }
 0x2cc   : > { %v665_v39 = vadd.f32 %v1147_v37, %v649_v36 }
 0x2cd   : > { %v585_v40 = vpop.f32.mrf.mxu1 }
 0x2ce   : > { %681 = vst [vmem:[%s1837_s30 + $0x28] sm:$0xff] %v665_v39  ;;  %v664_v41 = vadd.f32 %v648_v38, %v585_v40 }
 0x2d0   : > { %680 = vst [vmem:[%s1837_s30 + $0x20] sm:$0xff] %v664_v41 }
 0x2d3   : > { %v1150_v43 = vpop.f32.mrf.mxu1 }
 0x2d4   : > { %v667_v45 = vadd.f32 %v1150_v43, %v651_v42 }
 0x2d5   : > { %v595_v46 = vpop.f32.mrf.mxu1 }
 0x2d6   : > { %683 = vst [vmem:[%s1837_s30 + $0x38] sm:$0xff] %v667_v45  ;;  %v666_v47 = vadd.f32 %v650_v44, %v595_v46 }
 0x2d8   : > { %682 = vst [vmem:[%s1837_s30 + $0x30] sm:$0xff] %v666_v47 }
 0x2db   : > { %v1153_v49 = vpop.f32.mrf.mxu1 }
 0x2dc   : > { %v669_v51 = vadd.f32 %v1153_v49, %v653_v48 }
 0x2dd   : > { %v605_v52 = vpop.f32.mrf.mxu1 }
 0x2de   : > { %685 = vst [vmem:[%s1837_s30 + $0x48] sm:$0xff] %v669_v51  ;;  %v668_v53 = vadd.f32 %v652_v50, %v605_v52 }
 0x2e0   : > { %684 = vst [vmem:[%s1837_s30 + $0x40] sm:$0xff] %v668_v53 }
 0x2e3   : > { %v1156_v55 = vpop.f32.mrf.mxu1 }
 0x2e4   : > { %v671_v57 = vadd.f32 %v1156_v55, %v655_v54 }
 0x2e5   : > { %v615_v58 = vpop.f32.mrf.mxu1 }
 0x2e6   : > { %687 = vst [vmem:[%s1837_s30 + $0x58] sm:$0xff] %v671_v57  ;;  %v670_v59 = vadd.f32 %v654_v56, %v615_v58 }
 0x2e8   : > { %686 = vst [vmem:[%s1837_s30 + $0x50] sm:$0xff] %v670_v59 }
 0x2eb   : > { %v1159_v61 = vpop.f32.mrf.mxu1 }
 0x2ec   : > { %v673_v63 = vadd.f32 %v1159_v61, %v657_v60 }
 0x2ed   : > { %v625_v0 = vpop.f32.mrf.mxu1 }
 0x2ee   : > { %689 = vst [vmem:[%s1837_s30 + $0x68] sm:$0xff] %v673_v63  ;;  %v672_v1 = vadd.f32 %v656_v62, %v625_v0 }
 0x2f0   : > { %688 = vst [vmem:[%s1837_s30 + $0x60] sm:$0xff] %v672_v1 }
 0x2f3   : > { %v1162_v3 = vpop.f32.mrf.mxu1 }
 0x2f4   : > { %v675_v5 = vadd.f32 %v1162_v3, %v659_v2  ;;  %695 = sbr.rel (%p1024_p11) target bundleno = 1088 (0x440), region = 44 }
 0x2f5   : > { %v635_v6 = vpop.f32.mrf.mxu1 }
 0x2f6   : > { %691 = vst [vmem:[%s1837_s30 + $0x78] sm:$0xff] %v675_v5  ;;  %v674_v7 = vadd.f32 %v658_v4, %v635_v6 }
 0x2f8   : > { %690 = vst [vmem:[%s1837_s30 + $0x70] sm:$0xff] %v674_v7 }
 0x2f9   : > { %v696_v8 = vld [vmem:[#allocation2] sm:$0x1]  ;;  %v1583_v9 = vmov 0   ;;  %v698_v27 = vld [vmem:[%s1837_s30] sm:$0xff]  ;;  %v699_v30 = vld [vmem:[%s1837_s30 + $0x8] sm:$0xff] }
 0x2fa   : > { %1353 = vrcp.f32 %v696_v8  ;;  %1352 = vset.pattern.permute.xlu1 %v1583_v9  ;;  %v700_v33 = vld [vmem:[%s1837_s30 + $0x10] sm:$0xff]  ;;  %v701_v36 = vld [vmem:[%s1837_s30 + $0x18] sm:$0xff]  ;;  %v702_v39 = vld [vmem:[%s1837_s30 + $0x20] sm:$0xff] }
 0x2fb   : > { %v703_v42 = vld [vmem:[%s1837_s30 + $0x28] sm:$0xff]  ;;  %v704_v45 = vld [vmem:[%s1837_s30 + $0x30] sm:$0xff]  ;;  %v705_v48 = vld [vmem:[%s1837_s30 + $0x38] sm:$0xff] }
 0x2fc   : > { %v706_v51 = vld [vmem:[%s1837_s30 + $0x40] sm:$0xff]  ;;  %v707_v54 = vld [vmem:[%s1837_s30 + $0x48] sm:$0xff]  ;;  %v708_v57 = vld [vmem:[%s1837_s30 + $0x50] sm:$0xff] }
 0x2fd   : > { %v709_v60 = vld [vmem:[%s1837_s30 + $0x58] sm:$0xff]  ;;  %v710_v63 = vld [vmem:[%s1837_s30 + $0x60] sm:$0xff]  ;;  %v711_v2 = vld [vmem:[%s1837_s30 + $0x68] sm:$0xff] }
 0x2fe   : > { %v713_v8 = vld [vmem:[%s1837_s30 + $0x78] sm:$0xff] }
 0x2ff   : > { %v712_v5 = vld [vmem:[%s1837_s30 + $0x70] sm:$0xff] }
 0x307   : > { %v1354_v10 = vpop.eup %1353 }
 0x308   : > { %714 = vxpose.xlu0.b32.start.end [1/1] (short) %v1354_v10, 128 }
 0x331   : > { %1351 = vset.pattern.permute.xlu0 %v1583_v9 }
 0x384   : > { %v730_v11 = vpop.trf.xlu0 }
 0x385   : > { %748 = vperm.xlu0 %1351, %v730_v11  }
 0x388   : > { %v731_v12 = vpop.trf.xlu0 }
 0x389   : > { %753 = vperm.xlu1 %1352, %v731_v12  }
 0x38c   : > { %v732_v13 = vpop.trf.xlu0 }
 0x38d   : > { %758 = vperm.xlu1 %1352, %v732_v13  }
 0x390   : > { %v733_v14 = vpop.trf.xlu0 }
 0x391   : > { %763 = vperm.xlu1 %1352, %v733_v14  }
 0x394   : > { %v734_v15 = vpop.trf.xlu0 }
 0x395   : > { %768 = vperm.xlu1 %1352, %v734_v15  }
 0x398   : > { %v735_v16 = vpop.trf.xlu0 }
 0x399   : > { %773 = vperm.xlu1 %1352, %v735_v16  }
 0x39c   : > { %v736_v17 = vpop.trf.xlu0 }
 0x39d   : > { %778 = vperm.xlu1 %1352, %v736_v17  }
 0x3a0   : > { %v737_v18 = vpop.trf.xlu0 }
 0x3a1   : > { %783 = vperm.xlu1 %1352, %v737_v18  }
 0x3a4   : > { %v738_v19 = vpop.trf.xlu0 }
 0x3a5   : > { %788 = vperm.xlu1 %1352, %v738_v19  }
 0x3a8   : > { %v739_v20 = vpop.trf.xlu0 }
 0x3a9   : > { %793 = vperm.xlu1 %1352, %v739_v20  }
 0x3ac   : > { %v740_v21 = vpop.trf.xlu0 }
 0x3ad   : > { %798 = vperm.xlu1 %1352, %v740_v21  }
 0x3b0   : > { %v741_v22 = vpop.trf.xlu0 }
 0x3b1   : > { %803 = vperm.xlu1 %1352, %v741_v22  }
 0x3b4   : > { %v742_v23 = vpop.trf.xlu0 }
 0x3b5   : > { %808 = vperm.xlu1 %1352, %v742_v23  }
 0x3b8   : > { %v743_v24 = vpop.trf.xlu0 }
 0x3b9   : > { %813 = vperm.xlu1 %1352, %v743_v24  }
 0x3bc   : > { %v744_v25 = vpop.trf.xlu0 }
 0x3bd   : > { %818 = vperm.xlu1 %1352, %v744_v25  }
 0x3c0   : > { %v745_v26 = vpop.trf.xlu0 }
 0x3c1   : > { %823 = vperm.xlu1 %1352, %v745_v26  }
 0x400   : > { %v749_v28 = vpop.permute.xlu0 %748 }
 0x401   : > { %v826_v29 = vmul.f32 %v749_v28, %v698_v27 }
 0x403   : > { %842 = vst [vmem:[%s1837_s30] sm:$0xff] %v826_v29 }
 0x404   : > { %v754_v31 = vpop.permute.xlu1 %753 }
 0x405   : > { %v827_v32 = vmul.f32 %v754_v31, %v699_v30 }
 0x407   : > { %843 = vst [vmem:[%s1837_s30 + $0x8] sm:$0xff] %v827_v32 }
 0x408   : > { %v759_v34 = vpop.permute.xlu1 %758 }
 0x409   : > { %v828_v35 = vmul.f32 %v759_v34, %v700_v33 }
 0x40b   : > { %844 = vst [vmem:[%s1837_s30 + $0x10] sm:$0xff] %v828_v35 }
 0x40c   : > { %v764_v37 = vpop.permute.xlu1 %763 }
 0x40d   : > { %v829_v38 = vmul.f32 %v764_v37, %v701_v36 }
 0x40f   : > { %845 = vst [vmem:[%s1837_s30 + $0x18] sm:$0xff] %v829_v38 }
 0x410   : > { %v769_v40 = vpop.permute.xlu1 %768 }
 0x411   : > { %v830_v41 = vmul.f32 %v769_v40, %v702_v39 }
 0x413   : > { %846 = vst [vmem:[%s1837_s30 + $0x20] sm:$0xff] %v830_v41 }
 0x414   : > { %v774_v43 = vpop.permute.xlu1 %773 }
 0x415   : > { %v831_v44 = vmul.f32 %v774_v43, %v703_v42 }
 0x417   : > { %847 = vst [vmem:[%s1837_s30 + $0x28] sm:$0xff] %v831_v44 }
 0x418   : > { %v779_v46 = vpop.permute.xlu1 %778 }
 0x419   : > { %v832_v47 = vmul.f32 %v779_v46, %v704_v45 }
 0x41b   : > { %848 = vst [vmem:[%s1837_s30 + $0x30] sm:$0xff] %v832_v47 }
 0x41c   : > { %v784_v49 = vpop.permute.xlu1 %783 }
 0x41d   : > { %v833_v50 = vmul.f32 %v784_v49, %v705_v48 }
 0x41f   : > { %849 = vst [vmem:[%s1837_s30 + $0x38] sm:$0xff] %v833_v50 }
 0x420   : > { %v789_v52 = vpop.permute.xlu1 %788 }
 0x421   : > { %v834_v53 = vmul.f32 %v789_v52, %v706_v51 }
 0x423   : > { %850 = vst [vmem:[%s1837_s30 + $0x40] sm:$0xff] %v834_v53 }
 0x424   : > { %v794_v55 = vpop.permute.xlu1 %793 }
 0x425   : > { %v835_v56 = vmul.f32 %v794_v55, %v707_v54 }
 0x427   : > { %851 = vst [vmem:[%s1837_s30 + $0x48] sm:$0xff] %v835_v56 }
 0x428   : > { %v799_v58 = vpop.permute.xlu1 %798 }
 0x429   : > { %v836_v59 = vmul.f32 %v799_v58, %v708_v57 }
 0x42b   : > { %852 = vst [vmem:[%s1837_s30 + $0x50] sm:$0xff] %v836_v59 }
 0x42c   : > { %v804_v61 = vpop.permute.xlu1 %803 }
 0x42d   : > { %v837_v62 = vmul.f32 %v804_v61, %v709_v60 }
 0x42f   : > { %853 = vst [vmem:[%s1837_s30 + $0x58] sm:$0xff] %v837_v62 }
 0x430   : > { %v809_v0 = vpop.permute.xlu1 %808 }
 0x431   : > { %v838_v1 = vmul.f32 %v809_v0, %v710_v63 }
 0x433   : > { %854 = vst [vmem:[%s1837_s30 + $0x60] sm:$0xff] %v838_v1 }
 0x434   : > { %v814_v3 = vpop.permute.xlu1 %813 }
 0x435   : > { %v839_v4 = vmul.f32 %v814_v3, %v711_v2 }
 0x437   : > { %855 = vst [vmem:[%s1837_s30 + $0x68] sm:$0xff] %v839_v4 }
 0x438   : > { %v819_v6 = vpop.permute.xlu1 %818 }
 0x439   : > { %v840_v7 = vmul.f32 %v819_v6, %v712_v5 }
 0x43b   : > { %856 = vst [vmem:[%s1837_s30 + $0x70] sm:$0xff] %v840_v7 }
 0x43c   : > { %v824_v9 = vpop.permute.xlu1 %823 }
 0x43d   : > { %v841_v10 = vmul.f32 %v824_v9, %v713_v8 }
 0x43f   : > { %857 = vst [vmem:[%s1837_s30 + $0x78] sm:$0xff] %v841_v10 }
 0x440 PF: > { %s2105_s12 = sld [smem:[#allocation17_spill]]  ;;  %s874_s9 = sshll.u32 %s1837_s30, 4  ;;  %s1969_s9 = int_to_ptr.vmem [resolvable:$true] %s874_s9 }
 0x441   : > { %s2106_s3 = sld [smem:[#allocation16_spill]]  ;;  %s1978_s20 = scalar_lea.sflag [#allocation5], %s223_s7 }
 0x442   : > { %s2108_s10 = sld [smem:[#allocation23_spill]]  ;;  %s1411_s6 = scalar_lea.vmem %s1969_s9, 2048 }
 0x443   : > { %p1412_p1 = scmp.ne.s32.totalorder %s1969_s9, %s1411_s6  ;;  %p2110_p7 = scmp.ne.s32.totalorder %s2089_s15, 0 }
 0x444   : > { %s1584_s30 = smov [#allocation8]  }
 0x445   : > { %p1413_p13 = pnand %p1412_p1, %p2110_p7  ;;  %s1415_s27 = sshll.u32 %s1584_s30, 4  ;;  %s1416_s27 = int_to_ptr.vmem [resolvable:$false] %s1415_s27 }
 0x446   : > { %s1026_s28 = sshll.u32 %s2105_s12, 4  ;;  %s1417_s12 = scalar_lea.vmem %s1416_s27, 4096 }
 0x447   : > { %s1027_s26 = sshll.u32 %s2106_s3, 5  ;;  %p1414_p5 = pneg %p1413_p13 }
 0x448   : > { %s871_s18 = sadd.s32 %s1027_s26, %s1026_s28  ;;  %s2109_s4 = smov %s2108_s10 }
 0x449   : > { %s1028_s19 = sshll.u32 %s871_s18, 7  ;;  %p1418_p6 = scmp.lt.s32.totalorder %s1969_s9, %s1416_s27 }
 0x44a   : > { %s1974_s22 = scalar_lea.hbm %s2108_s10, %s1028_s19  ;;  %p1419_p0 = scmp.lt.s32.totalorder %s1417_s12, %s1411_s6 }
 0x44c   : > { %p1420_p9 = por %p1419_p0, %p1418_p6 }
 0x44e   : > { %p1421_p10 = pnand %p1420_p9, %p1414_p5 }
 0x450   : > { %1424 = shalt.err (!%p1421_p10)
}
 0x451   : > { %s1425_s7 = scalar_lea.hbm %s1974_s22, 2048  ;;  %s1429_s28 = scalar_lea.hbm %s2109_s4, 8192 }
 0x452   : > { %p1426_p12 = scmp.ne.s32.totalorder %s1974_s22, %s1425_s7  ;;  %p1430_p2 = scmp.lt.s32.totalorder %s1974_s22, %s2109_s4 }
 0x453   : > { %p1431_p8 = scmp.lt.s32.totalorder %s1429_s28, %s1425_s7 }
 0x454   : > { %p1427_p3 = pnand %p1426_p12, %p2110_p7 }
 0x455   : > { %p1432_p11 = por %p1431_p8, %p1430_p2 }
 0x456   : > { %p1428_p4 = pneg %p1427_p3 }
 0x458   : > { %p1433_p1 = pnand %p1432_p11, %p1428_p4 }
 0x45a   : > { %1436 = shalt.err (!%p1433_p1)
}
 0x45b   : > { %s1585_s19 = smov 128   ;;  %s1586_s0 = smov 8  }
 0x45c   : > { %1167 = dma.vmem_to_hbm [thread:$0]  (%p2110_p7), %s1969_s9, 2048, %s1974_s22, %s1978_s20, %s1585_s19, %s1585_s19, %s1586_s0  }
 0x45d PF: > { %s2111_s25 = sld [smem:[#allocation12_spill]]  ;;  %p1181_p13 = scmp.ge.s32.totalorder %s1575_s24, 2 }
 0x45e   : > { %p2112_p5 = scmp.ne.s32.totalorder %s2091_s2, 0 }
 0x460   : > { %p1177_p6 = pnand %p1181_p13, %p2112_p5 }
 0x462   : > { %p1178_p0 = pneg %p1177_p6 }
 0x463   : > { %s889_s10 = sand.u32 1, %s2111_s25  }
 0x464   : > { %s890_s6 = scalar_lea.sflag [#allocation5], %s889_s10 }
 0x465   : > { %1510 = dma.done.wait (%p1178_p0), %s890_s6, 2048  }
 0x466   : > { %1512 = vsyncadd (%p1178_p0), %s890_s6, 4294965248  ;;  %s21_s24 = sadd.s32 1, %s1575_s24   ;;  %s2114_s9 = sld [smem:[#allocation13_spill]] }
 0x467   : > { %p2006_p9 = scmp.ge.s32.totalorder %s21_s24, 18   ;;  %s2115_s22 = sld [smem:[#allocation14_spill]] }
 0x468   : > { %s2116_s17 = sld [smem:[#allocation21_spill]]  ;;  %s2120_s10 = smov %s1523_s11 }
 0x469   : > { %s2117_s19 = sld [smem:[#allocation18_spill]]  ;;  %s2121_s11 = smov %s1798_s8 }
 0x46a   : > { %s2118_s2 = sld [smem:[#allocation19_spill]]  ;;  %s2122_s12 = smov %s1531_s13 }
 0x46b   : > { %s2119_s27 = sld [smem:[#allocation20_spill]]  ;;  %s2123_s13 = smov %s1535_s14 }
 0x46c   : > { %s2124_s14 = smov %s1795_s29  ;;  %s2125_s15 = smov %s1543_s16 }
 0x46d   : > { %s2126_s16 = smov %s2115_s22  ;;  %s2127_s18 = smov %s1563_s21 }
 0x46e   : > { %s2128_s20 = smov %s1571_s23  ;;  %s2131_s23 = smov %s2139_s5 }
 0x46f   :  { %20 = sbr.rel (!%p2006_p9) target bundleno = 16 (0x10), region = 94 }
 0x470   : > { %s2129_s21 = smov %s2118_s2 }
 0x471   : > { %s2130_s22 = smov %s2119_s27 }
 0x474   :  { %895 = vsyncpa [#allocation4], 1 }
 0x475   :  { %897 = vsyncpa [#allocation4 + $0x1], 1 }
 0x476   :  { %898 = vsyncpa [#allocation7], 1 }
 0x477   :  { %900 = vsyncpa [#allocation7 + $0x1], 1 }
 0x478   :  { %901 = vsyncpa [#allocation5], 1 }
 0x479   :  { %903 = vsyncpa [#allocation5 + $0x1], 1 }

</bundles_post_ra>
